<compile_context>
chip_gen: v7x
topology: tpu7x:2x2x1
jax: 0.10.0
libtpu: 0.0.40
codegen_flags: <defaults>
</compile_context>

<pallas_src>
import functools
import math

import jax
import jax.numpy as jnp
from jax import lax
from jax.experimental import pallas as pl
from jax.experimental.pallas import tpu as pltpu

# ---- config (mirrors __C) ----
HIDDEN_SIZE = 32
MULTI_HEAD = 4
FF_SIZE = 128
DROPOUT_R = 0.0          # dropout disabled -> identity
LN_EPS = 1e-6
_QKV_PAD = 128           # lane width of fused QKV weight (>= 3*H, = FF_SIZE)

# rows (8-sublane aligned) at which each (1, H) vector lives inside the packed
# `vec` array, so every slice is an aligned sublane access.
_VEC_NAMES = ("bm", "g1", "be1", "bb2", "g2", "be2")
_VEC_ROW = {name: 8 * i for i, name in enumerate(_VEC_NAMES)}


def _layernorm(x, g, b, n):
    # torch LayerNorm in this model: weight * (x - mean) / (std + eps) + bias
    # with UNBIASED std (ddof=1) and eps added to std (not var).  Exact divide.
    mean = jnp.mean(x, axis=-1, keepdims=True)
    var = jnp.sum((x - mean) ** 2, axis=-1, keepdims=True) * (1.0 / (n - 1))
    return g * (x - mean) / (jnp.sqrt(var) + LN_EPS) + b


def sa_kernel(*refs, has_pos):
    if has_pos:
        y_ref, pos_ref, mask_ref, wa_ref, wb_ref, vec_ref, out_ref = refs
    else:
        y_ref, mask_ref, wa_ref, wb_ref, vec_ref, out_ref = refs
        pos_ref = None

    TB, S, H = y_ref.shape
    nH = MULTI_HEAD
    dk = H // nH
    N = TB * S
    F = FF_SIZE

    def vec(name):
        r = _VEC_ROW[name]
        return vec_ref[r:r + 1, :]                       # (1, H)

    # packed, pre-transposed weights (x @ W directly; no in-kernel .T)
    wqkv = wb_ref[0:H, :]                                # (H, 128) [wq*s | wk | wv | 0]
    w1 = wb_ref[H:2 * H, :]                              # (H, F)
    bqkv = wb_ref[2 * H:2 * H + 1, :]                    # (1, 128)
    bb1 = wb_ref[2 * H + 8:2 * H + 9, :]                 # (1, F)
    w2 = wa_ref[H:H + F, :]                              # (F, H)

    y3 = y_ref[...]                                      # (TB, S, H)
    y2 = y3.reshape(N, H)                                # merge leading dims only
    if has_pos:
        qk2 = (y3 + pos_ref[...]).reshape(N, H)          # pos broadcasts over batch
    else:
        qk2 = y2

    # fused QKV projection (scale folded into q columns, biases fused into one row)
    if has_pos:
        qk = jnp.dot(qk2, wqkv, preferred_element_type=jnp.float32) + bqkv
        vv = jnp.dot(y2, wqkv, preferred_element_type=jnp.float32) + bqkv
    else:
        qk = jnp.dot(y2, wqkv, preferred_element_type=jnp.float32) + bqkv
        vv = qk

    mask = mask_ref[...]                                 # (TB, 1, S) additive (-1e9 masked)

    dn_qk = (((2,), (2,)), ((0,), (0,)))   # contract head dims (k transpose folded in)
    dn_pv = (((2,), (1,)), ((0,), (0,)))

    atted = jnp.zeros((N, H), jnp.float32)
    for h in range(nH):
        qh = qk[:, h * dk:(h + 1) * dk].reshape(TB, S, dk)
        kh = qk[:, H + h * dk:H + (h + 1) * dk].reshape(TB, S, dk)
        vh = vv[:, 2 * H + h * dk:2 * H + (h + 1) * dk].reshape(TB, S, dk)
        sc = lax.dot_general(qh, kh, dn_qk, preferred_element_type=jnp.float32)
        sc = sc + mask                                   # sublane broadcast, nothing held live
        m = jnp.max(sc, axis=-1, keepdims=True)
        e = jnp.exp(sc - m)
        p = e / jnp.sum(e, axis=-1, keepdims=True)       # exact divide (numeric parity)
        ah = lax.dot_general(p, vh, dn_pv, preferred_element_type=jnp.float32)
        # fused merge: concat(heads) @ wm^T == sum_h head_h @ wm^T[h*dk:(h+1)*dk]
        wm_h = wa_ref[h * dk:(h + 1) * dk, :]            # (dk, H)
        atted = atted + jnp.dot(ah.reshape(N, dk), wm_h,
                                preferred_element_type=jnp.float32)
    atted = atted + vec("bm")

    # residual + norm1
    y1 = _layernorm(y2 + atted, vec("g1"), vec("be1"), H)

    # FFN: H -> FF (relu) -> H
    h1 = jnp.maximum(jnp.dot(y1, w1, preferred_element_type=jnp.float32) + bb1, 0.0)
    ff = jnp.dot(h1, w2, preferred_element_type=jnp.float32) + vec("bb2")

    # residual + norm2
    out_ref[...] = _layernorm(y1 + ff, vec("g2"), vec("be2"), H).reshape(TB, S, H)


def _choose_tb(batch, seq, target_rows=2048):
    """Largest batch tile with TB*S <= target_rows.  Prefer an EVEN number of
    >= 2 grid steps so the 'parallel' axis splits evenly across v7x's 2 TCs."""
    target_tb = max(1, target_rows // max(1, seq))
    divs = [d for d in range(1, batch + 1) if batch % d == 0 and d <= target_tb]
    if not divs:
        return 1
    even = [d for d in divs if batch // d >= 2 and (batch // d) % 2 == 0]
    return max(even) if even else max(divs)


def _pad_rows(x, rows):
    return jnp.concatenate(
        [x, jnp.zeros((rows - x.shape[0], x.shape[1]), x.dtype)], axis=0)


def pack_params(params):
    (wq, bq, wk, bk, wv, bv, wm, bm, g1, be1, w1, bb1, w2, bb2, g2, be2) = params
    H, F, P = HIDDEN_SIZE, FF_SIZE, _QKV_PAD
    assert P >= 3 * H and P == F
    scale = 1.0 / math.sqrt(H // MULTI_HEAD)

    # wa stream (H-wide outputs): [wm^T ; w2^T]   -> (H+F, H)
    wa = jnp.concatenate([wm.T, w2.T], axis=0).astype(jnp.float32)

    # wb stream (128 lanes): fused QKV weight (q pre-scaled), w1^T, fused biases
    wqkv = jnp.concatenate([wq.T * scale, wk.T, wv.T], axis=1)          # (H, 3H)
    wqkv = jnp.pad(wqkv, ((0, 0), (0, P - 3 * H)))                      # (H, 128)
    bqkv = jnp.concatenate([bq.reshape(1, H) * scale, bk.reshape(1, H),
                            bv.reshape(1, H)], axis=1)
    bqkv = jnp.pad(bqkv, ((0, 0), (0, P - 3 * H)))                      # (1, 128)
    wb = jnp.concatenate([wqkv, w1.T, _pad_rows(bqkv, 8),
                          _pad_rows(bb1.reshape(1, F), 8)],
                         axis=0).astype(jnp.float32)                    # (2H+16, 128)

    # vec stream: remaining (1, H) bias / LN vectors at 8-row spacing
    named = dict(bm=bm, g1=g1, be1=be1, bb2=bb2, g2=g2, be2=be2)
    rows = [_pad_rows(named[n].reshape(1, H), 8) for n in _VEC_NAMES]
    vec = jnp.concatenate(rows, axis=0).astype(jnp.float32)             # (48, H)
    return wa, wb, vec


def sa_forward(y, y_mask, params, pos=None):
    """Pallas forward of SA. y: (B,S,H) f32, y_mask: (B,1,1,S) (nonzero=masked)."""
    B, S, H = y.shape
    assert H == HIDDEN_SIZE
    wa, wb, vec = pack_params(params)

    # additive mask precomputed once on the host
    mask_add = jnp.where(y_mask.reshape(B, 1, S) > 0, -1e9, 0.0).astype(jnp.float32)

    tb = _choose_tb(B, S)
    grid = (B // tb,)
    has_pos = pos is not None

    act_spec = pl.BlockSpec((tb, S, H), lambda b: (b, 0, 0))
    in_specs = [act_spec]
    inputs = [y.astype(jnp.float32)]
    if has_pos:
        pos = jnp.asarray(pos, jnp.float32)
        if pos.ndim == 2:
            pos = pos[None]
        if pos.shape[0] == 1:
            # constant-index block: fetched once, reused across all grid steps
            in_specs.append(pl.BlockSpec((1, S, H), lambda b: (0, 0, 0)))
        else:
            in_specs.append(act_spec)
        inputs.append(pos)
    in_specs += [
        pl.BlockSpec((tb, 1, S), lambda b: (b, 0, 0)),   # additive mask
        pl.BlockSpec(wa.shape, lambda b: (0, 0)),        # wm^T + w2^T (H-wide)
        pl.BlockSpec(wb.shape, lambda b: (0, 0)),        # fused QKV + w1^T + biases (128-wide)
        pl.BlockSpec(vec.shape, lambda b: (0, 0)),       # packed bias / LN vectors
    ]
    inputs += [mask_add, wa, wb, vec]

    return pl.pallas_call(
        functools.partial(sa_kernel, has_pos=has_pos),
        out_shape=jax.ShapeDtypeStruct((B, S, H), jnp.float32),
        grid_spec=pltpu.PrefetchScalarGridSpec(
            num_scalar_prefetch=0,
            grid=grid,
            in_specs=in_specs,
            out_specs=pl.BlockSpec((tb, S, H), lambda b: (b, 0, 0))),
        compiler_params=pltpu.CompilerParams(
            dimension_semantics=("parallel",),
            vmem_limit_bytes=32 * 1024 * 1024),
    )(*inputs)


# ---------------- pure-JAX reference (for sanity check) ----------------
def sa_reference(y, y_mask, params, pos=None):
    (wq, bq, wk, bk, wv, bv, wm, bm, g1, be1, w1, bb1, w2, bb2, g2, be2) = params
    B, S, H = y.shape
    nH, dk = MULTI_HEAD, H // MULTI_HEAD
    qk = y if pos is None else y + pos
    lin = lambda x, w, b: x @ w.T + b
    q = lin(qk, wq, bq).reshape(B, S, nH, dk).transpose(0, 2, 1, 3)
    k = lin(qk, wk, bk).reshape(B, S, nH, dk).transpose(0, 2, 1, 3)
    v = lin(y,  wv, bv).reshape(B, S, nH, dk).transpose(0, 2, 1, 3)
    sc = jnp.einsum('bhqd,bhkd->bhqk', q, k) / math.sqrt(dk)
    sc = jnp.where(y_mask > 0, -1e9, sc)
    p = jax.nn.softmax(sc, axis=-1)
    att = jnp.einsum('bhqk,bhkd->bhqd', p, v).transpose(0, 2, 1, 3).reshape(B, S, H)
    att = lin(att, wm, bm)

    def ln(x, g, b):
        mean = x.mean(-1, keepdims=True)
        std = jnp.sqrt(((x - mean) ** 2).sum(-1, keepdims=True) / (H - 1))
        return g * (x - mean) / (std + LN_EPS) + b

    y1 = ln(y + att, g1, be1)
    ff = lin(jnp.maximum(lin(y1, w1, bb1), 0.0), w2, bb2)
    return ln(y1 + ff, g2, be2)


def init_params(key):
    ks = jax.random.split(key, 12)
    H, F = HIDDEN_SIZE, FF_SIZE

    def lin_init(k, out_dim, in_dim):
        kw, kb = jax.random.split(k)
        w = jax.random.normal(kw, (out_dim, in_dim), jnp.float32) * 0.05
        b = jax.random.normal(kb, (1, out_dim), jnp.float32) * 0.01
        return w, b

    wq, bq = lin_init(ks[0], H, H)
    wk, bk = lin_init(ks[1], H, H)
    wv, bv = lin_init(ks[2], H, H)
    wm, bm = lin_init(ks[3], H, H)
    w1, bb1 = lin_init(ks[4], F, H)       # MLP: H -> FF
    w2, bb2 = lin_init(ks[5], H, F)       # MLP: FF -> H
    g1 = jnp.ones((1, H), jnp.float32)
    be1 = jnp.zeros((1, H), jnp.float32)
    g2 = jnp.ones((1, H), jnp.float32)
    be2 = jnp.zeros((1, H), jnp.float32)
    return (wq, bq, wk, bk, wv, bv, wm, bm, g1, be1, w1, bb1, w2, bb2, g2, be2)


if __name__ == "__main__":
    B, S, H = 2, 8, HIDDEN_SIZE
    key = jax.random.PRNGKey(0)
    k_y, k_p, k_params = jax.random.split(key, 3)

    y = jax.random.normal(k_y, (B, S, H), jnp.float32)
    # key-padding mask: batch 0 has last 2 keys masked, batch 1 unmasked
    # (fully-masked rows are not exercised; additive -1e9 matches masked_fill
    #  whenever each query has >= 1 valid key)
    lens = jnp.array([6, 8], dtype=jnp.int32)
    y_mask = (jnp.arange(S)[None, :] >= lens[:, None]).astype(jnp.float32)
    y_mask = y_mask.reshape(B, 1, 1, S)

    params = init_params(k_params)

    out = sa_forward(y, y_mask, params, pos=None)
    out = jax.block_until_ready(out)

    ref = sa_reference(y, y_mask, params, pos=None)
    assert out.shape == (B, S, H)
    assert jnp.allclose(out, ref, atol=1e-3, rtol=1e-3), \
        f"max abs err {jnp.max(jnp.abs(out - ref))}"

    print("KERNEL_OK")
</pallas_src>

<mosaic_0001>
module attributes {stable_mosaic.version = 11 : i64} {
  func.func @sa_kernel(%arg0: i32, %arg1: memref<1x8x32xf32, #tpu.memory_space<vmem>>, %arg2: memref<1x1x8xf32, #tpu.memory_space<vmem>>, %arg3: memref<160x32xf32, #tpu.memory_space<vmem>>, %arg4: memref<80x128xf32, #tpu.memory_space<vmem>>, %arg5: memref<48x32xf32, #tpu.memory_space<vmem>>, %arg6: memref<1x8x32xf32, #tpu.memory_space<vmem>>) attributes {dimension_semantics = [#tpu.dimension_semantics<parallel>], iteration_bounds = array<i64: 2>, scalar_prefetch = 0 : i64, scratch_operands = 0 : i64, tpu.core_type = #tpu.core_type<tc>, window_params = [{transform_indices = @transform_0, window_bounds = array<i64: 1, 8, 32>}, {transform_indices = @transform_1, window_bounds = array<i64: 1, 1, 8>}, {pipeline_mode = #tpu.pipeline_mode<synchronous>, transform_indices = @transform_2, window_bounds = array<i64: 160, 32>}, {pipeline_mode = #tpu.pipeline_mode<synchronous>, transform_indices = @transform_3, window_bounds = array<i64: 80, 128>}, {pipeline_mode = #tpu.pipeline_mode<synchronous>, transform_indices = @transform_4, window_bounds = array<i64: 48, 32>}, {transform_indices = @transform_5, window_bounds = array<i64: 1, 8, 32>}]} {
    %c0 = arith.constant 0 : index
    %c0_0 = arith.constant 0 : index
    %0 = vector.load %arg4[%c0, %c0_0] : memref<80x128xf32, #tpu.memory_space<vmem>>, vector<32x128xf32>
    %c32 = arith.constant 32 : index
    %c0_1 = arith.constant 0 : index
    %1 = vector.load %arg4[%c32, %c0_1] : memref<80x128xf32, #tpu.memory_space<vmem>>, vector<32x128xf32>
    %c64 = arith.constant 64 : index
    %c0_2 = arith.constant 0 : index
    %2 = vector.load %arg4[%c64, %c0_2] : memref<80x128xf32, #tpu.memory_space<vmem>>, vector<1x128xf32>
    %c72 = arith.constant 72 : index
    %c0_3 = arith.constant 0 : index
    %3 = vector.load %arg4[%c72, %c0_3] : memref<80x128xf32, #tpu.memory_space<vmem>>, vector<1x128xf32>
    %c32_4 = arith.constant 32 : index
    %c0_5 = arith.constant 0 : index
    %4 = vector.load %arg3[%c32_4, %c0_5] : memref<160x32xf32, #tpu.memory_space<vmem>>, vector<128x32xf32>
    %c0_6 = arith.constant 0 : index
    %c0_7 = arith.constant 0 : index
    %c0_8 = arith.constant 0 : index
    %5 = vector.load %arg1[%c0_6, %c0_7, %c0_8] : memref<1x8x32xf32, #tpu.memory_space<vmem>>, vector<1x8x32xf32>
    %6 = vector.shape_cast %5 : vector<1x8x32xf32> to vector<8x32xf32>
    %cst = arith.constant dense<0.000000e+00> : vector<8x128xf32>
    %7 = tpu.matmul %6, %0, %cst {dimension_numbers = #tpu.dot_dimension_numbers<[1], [0], [0], [1], [0, 0, 1, 1], [], []>} : vector<8x32xf32>, vector<32x128xf32>, vector<8x128xf32> -> vector<8x128xf32>
    %8 = vector.broadcast %2 : vector<1x128xf32> to vector<8x128xf32>
    %9 = arith.addf %7, %8 : vector<8x128xf32>
    %c0_9 = arith.constant 0 : index
    %c0_10 = arith.constant 0 : index
    %c0_11 = arith.constant 0 : index
    %10 = vector.load %arg2[%c0_9, %c0_10, %c0_11] : memref<1x1x8xf32, #tpu.memory_space<vmem>>, vector<1x1x8xf32>
    %cst_12 = arith.constant 0.000000e+00 : f32
    %11 = vector.broadcast %cst_12 : f32 to vector<8x32xf32>
    %12 = vector.extract_strided_slice %9 {offsets = [0, 0], sizes = [8, 8], strides = [1, 1]} : vector<8x128xf32> to vector<8x8xf32>
    %13 = vector.shape_cast %12 : vector<8x8xf32> to vector<1x8x8xf32>
    %14 = vector.extract_strided_slice %9 {offsets = [0, 32], sizes = [8, 8], strides = [1, 1]} : vector<8x128xf32> to vector<8x8xf32>
    %15 = vector.shape_cast %14 : vector<8x8xf32> to vector<1x8x8xf32>
    %16 = vector.extract_strided_slice %9 {offsets = [0, 64], sizes = [8, 8], strides = [1, 1]} : vector<8x128xf32> to vector<8x8xf32>
    %17 = vector.shape_cast %16 : vector<8x8xf32> to vector<1x8x8xf32>
    %cst_13 = arith.constant dense<0.000000e+00> : vector<1x8x8xf32>
    %18 = tpu.matmul %13, %15, %cst_13 {dimension_numbers = #tpu.dot_dimension_numbers<[2], [2], [1], [1], [0, 0, 0, 1, 1, 1], [0], [0]>} : vector<1x8x8xf32>, vector<1x8x8xf32>, vector<1x8x8xf32> -> vector<1x8x8xf32>
    %19 = vector.broadcast %10 : vector<1x1x8xf32> to vector<1x8x8xf32>
    %20 = arith.addf %18, %19 : vector<1x8x8xf32>
    %cst_14 = arith.constant dense<0xFF800000> : vector<1x8xf32>
    %21 = vector.multi_reduction <maximumf>, %20, %cst_14 [2] : vector<1x8x8xf32> to vector<1x8xf32>
    %22 = vector.shape_cast %21 : vector<1x8xf32> to vector<1x8x1xf32>
    %23 = vector.broadcast %22 : vector<1x8x1xf32> to vector<1x8x8xf32>
    %24 = arith.subf %20, %23 : vector<1x8x8xf32>
    %25 = math.exp %24 : vector<1x8x8xf32>
    %cst_15 = arith.constant dense<0.000000e+00> : vector<1x8xf32>
    %26 = vector.multi_reduction <add>, %25, %cst_15 [2] : vector<1x8x8xf32> to vector<1x8xf32>
    %27 = vector.shape_cast %26 : vector<1x8xf32> to vector<1x8x1xf32>
    %28 = vector.broadcast %27 : vector<1x8x1xf32> to vector<1x8x8xf32>
    %29 = arith.divf %25, %28 : vector<1x8x8xf32>
    %cst_16 = arith.constant dense<0.000000e+00> : vector<1x8x8xf32>
    %30 = tpu.matmul %29, %17, %cst_16 {dimension_numbers = #tpu.dot_dimension_numbers<[2], [1], [1], [2], [0, 0, 0, 1, 1, 2], [0], [0]>} : vector<1x8x8xf32>, vector<1x8x8xf32>, vector<1x8x8xf32> -> vector<1x8x8xf32>
    %c0_17 = arith.constant 0 : index
    %c0_18 = arith.constant 0 : index
    %31 = vector.load %arg3[%c0_17, %c0_18] : memref<160x32xf32, #tpu.memory_space<vmem>>, vector<8x32xf32>
    %32 = vector.shape_cast %30 : vector<1x8x8xf32> to vector<8x8xf32>
    %cst_19 = arith.constant dense<0.000000e+00> : vector<8x32xf32>
    %33 = tpu.matmul %32, %31, %cst_19 {dimension_numbers = #tpu.dot_dimension_numbers<[1], [0], [0], [1], [0, 0, 1, 1], [], []>} : vector<8x8xf32>, vector<8x32xf32>, vector<8x32xf32> -> vector<8x32xf32>
    %34 = arith.addf %11, %33 : vector<8x32xf32>
    %35 = vector.extract_strided_slice %9 {offsets = [0, 8], sizes = [8, 8], strides = [1, 1]} : vector<8x128xf32> to vector<8x8xf32>
    %36 = vector.shape_cast %35 : vector<8x8xf32> to vector<1x8x8xf32>
    %37 = vector.extract_strided_slice %9 {offsets = [0, 40], sizes = [8, 8], strides = [1, 1]} : vector<8x128xf32> to vector<8x8xf32>
    %38 = vector.shape_cast %37 : vector<8x8xf32> to vector<1x8x8xf32>
    %39 = vector.extract_strided_slice %9 {offsets = [0, 72], sizes = [8, 8], strides = [1, 1]} : vector<8x128xf32> to vector<8x8xf32>
    %40 = vector.shape_cast %39 : vector<8x8xf32> to vector<1x8x8xf32>
    %cst_20 = arith.constant dense<0.000000e+00> : vector<1x8x8xf32>
    %41 = tpu.matmul %36, %38, %cst_20 {dimension_numbers = #tpu.dot_dimension_numbers<[2], [2], [1], [1], [0, 0, 0, 1, 1, 1], [0], [0]>} : vector<1x8x8xf32>, vector<1x8x8xf32>, vector<1x8x8xf32> -> vector<1x8x8xf32>
    %42 = vector.broadcast %10 : vector<1x1x8xf32> to vector<1x8x8xf32>
    %43 = arith.addf %41, %42 : vector<1x8x8xf32>
    %cst_21 = arith.constant dense<0xFF800000> : vector<1x8xf32>
    %44 = vector.multi_reduction <maximumf>, %43, %cst_21 [2] : vector<1x8x8xf32> to vector<1x8xf32>
    %45 = vector.shape_cast %44 : vector<1x8xf32> to vector<1x8x1xf32>
    %46 = vector.broadcast %45 : vector<1x8x1xf32> to vector<1x8x8xf32>
    %47 = arith.subf %43, %46 : vector<1x8x8xf32>
    %48 = math.exp %47 : vector<1x8x8xf32>
    %cst_22 = arith.constant dense<0.000000e+00> : vector<1x8xf32>
    %49 = vector.multi_reduction <add>, %48, %cst_22 [2] : vector<1x8x8xf32> to vector<1x8xf32>
    %50 = vector.shape_cast %49 : vector<1x8xf32> to vector<1x8x1xf32>
    %51 = vector.broadcast %50 : vector<1x8x1xf32> to vector<1x8x8xf32>
    %52 = arith.divf %48, %51 : vector<1x8x8xf32>
    %cst_23 = arith.constant dense<0.000000e+00> : vector<1x8x8xf32>
    %53 = tpu.matmul %52, %40, %cst_23 {dimension_numbers = #tpu.dot_dimension_numbers<[2], [1], [1], [2], [0, 0, 0, 1, 1, 2], [0], [0]>} : vector<1x8x8xf32>, vector<1x8x8xf32>, vector<1x8x8xf32> -> vector<1x8x8xf32>
    %c8 = arith.constant 8 : index
    %c0_24 = arith.constant 0 : index
    %54 = vector.load %arg3[%c8, %c0_24] : memref<160x32xf32, #tpu.memory_space<vmem>>, vector<8x32xf32>
    %55 = vector.shape_cast %53 : vector<1x8x8xf32> to vector<8x8xf32>
    %cst_25 = arith.constant dense<0.000000e+00> : vector<8x32xf32>
    %56 = tpu.matmul %55, %54, %cst_25 {dimension_numbers = #tpu.dot_dimension_numbers<[1], [0], [0], [1], [0, 0, 1, 1], [], []>} : vector<8x8xf32>, vector<8x32xf32>, vector<8x32xf32> -> vector<8x32xf32>
    %57 = arith.addf %34, %56 : vector<8x32xf32>
    %58 = vector.extract_strided_slice %9 {offsets = [0, 16], sizes = [8, 8], strides = [1, 1]} : vector<8x128xf32> to vector<8x8xf32>
    %59 = vector.shape_cast %58 : vector<8x8xf32> to vector<1x8x8xf32>
    %60 = vector.extract_strided_slice %9 {offsets = [0, 48], sizes = [8, 8], strides = [1, 1]} : vector<8x128xf32> to vector<8x8xf32>
    %61 = vector.shape_cast %60 : vector<8x8xf32> to vector<1x8x8xf32>
    %62 = vector.extract_strided_slice %9 {offsets = [0, 80], sizes = [8, 8], strides = [1, 1]} : vector<8x128xf32> to vector<8x8xf32>
    %63 = vector.shape_cast %62 : vector<8x8xf32> to vector<1x8x8xf32>
    %cst_26 = arith.constant dense<0.000000e+00> : vector<1x8x8xf32>
    %64 = tpu.matmul %59, %61, %cst_26 {dimension_numbers = #tpu.dot_dimension_numbers<[2], [2], [1], [1], [0, 0, 0, 1, 1, 1], [0], [0]>} : vector<1x8x8xf32>, vector<1x8x8xf32>, vector<1x8x8xf32> -> vector<1x8x8xf32>
    %65 = vector.broadcast %10 : vector<1x1x8xf32> to vector<1x8x8xf32>
    %66 = arith.addf %64, %65 : vector<1x8x8xf32>
    %cst_27 = arith.constant dense<0xFF800000> : vector<1x8xf32>
    %67 = vector.multi_reduction <maximumf>, %66, %cst_27 [2] : vector<1x8x8xf32> to vector<1x8xf32>
    %68 = vector.shape_cast %67 : vector<1x8xf32> to vector<1x8x1xf32>
    %69 = vector.broadcast %68 : vector<1x8x1xf32> to vector<1x8x8xf32>
    %70 = arith.subf %66, %69 : vector<1x8x8xf32>
    %71 = math.exp %70 : vector<1x8x8xf32>
    %cst_28 = arith.constant dense<0.000000e+00> : vector<1x8xf32>
    %72 = vector.multi_reduction <add>, %71, %cst_28 [2] : vector<1x8x8xf32> to vector<1x8xf32>
    %73 = vector.shape_cast %72 : vector<1x8xf32> to vector<1x8x1xf32>
    %74 = vector.broadcast %73 : vector<1x8x1xf32> to vector<1x8x8xf32>
    %75 = arith.divf %71, %74 : vector<1x8x8xf32>
    %cst_29 = arith.constant dense<0.000000e+00> : vector<1x8x8xf32>
    %76 = tpu.matmul %75, %63, %cst_29 {dimension_numbers = #tpu.dot_dimension_numbers<[2], [1], [1], [2], [0, 0, 0, 1, 1, 2], [0], [0]>} : vector<1x8x8xf32>, vector<1x8x8xf32>, vector<1x8x8xf32> -> vector<1x8x8xf32>
    %c16 = arith.constant 16 : index
    %c0_30 = arith.constant 0 : index
    %77 = vector.load %arg3[%c16, %c0_30] : memref<160x32xf32, #tpu.memory_space<vmem>>, vector<8x32xf32>
    %78 = vector.shape_cast %76 : vector<1x8x8xf32> to vector<8x8xf32>
    %cst_31 = arith.constant dense<0.000000e+00> : vector<8x32xf32>
    %79 = tpu.matmul %78, %77, %cst_31 {dimension_numbers = #tpu.dot_dimension_numbers<[1], [0], [0], [1], [0, 0, 1, 1], [], []>} : vector<8x8xf32>, vector<8x32xf32>, vector<8x32xf32> -> vector<8x32xf32>
    %80 = arith.addf %57, %79 : vector<8x32xf32>
    %81 = vector.extract_strided_slice %9 {offsets = [0, 24], sizes = [8, 8], strides = [1, 1]} : vector<8x128xf32> to vector<8x8xf32>
    %82 = vector.shape_cast %81 : vector<8x8xf32> to vector<1x8x8xf32>
    %83 = vector.extract_strided_slice %9 {offsets = [0, 56], sizes = [8, 8], strides = [1, 1]} : vector<8x128xf32> to vector<8x8xf32>
    %84 = vector.shape_cast %83 : vector<8x8xf32> to vector<1x8x8xf32>
    %85 = vector.extract_strided_slice %9 {offsets = [0, 88], sizes = [8, 8], strides = [1, 1]} : vector<8x128xf32> to vector<8x8xf32>
    %86 = vector.shape_cast %85 : vector<8x8xf32> to vector<1x8x8xf32>
    %cst_32 = arith.constant dense<0.000000e+00> : vector<1x8x8xf32>
    %87 = tpu.matmul %82, %84, %cst_32 {dimension_numbers = #tpu.dot_dimension_numbers<[2], [2], [1], [1], [0, 0, 0, 1, 1, 1], [0], [0]>} : vector<1x8x8xf32>, vector<1x8x8xf32>, vector<1x8x8xf32> -> vector<1x8x8xf32>
    %88 = vector.broadcast %10 : vector<1x1x8xf32> to vector<1x8x8xf32>
    %89 = arith.addf %87, %88 : vector<1x8x8xf32>
    %cst_33 = arith.constant dense<0xFF800000> : vector<1x8xf32>
    %90 = vector.multi_reduction <maximumf>, %89, %cst_33 [2] : vector<1x8x8xf32> to vector<1x8xf32>
    %91 = vector.shape_cast %90 : vector<1x8xf32> to vector<1x8x1xf32>
    %92 = vector.broadcast %91 : vector<1x8x1xf32> to vector<1x8x8xf32>
    %93 = arith.subf %89, %92 : vector<1x8x8xf32>
    %94 = math.exp %93 : vector<1x8x8xf32>
    %cst_34 = arith.constant dense<0.000000e+00> : vector<1x8xf32>
    %95 = vector.multi_reduction <add>, %94, %cst_34 [2] : vector<1x8x8xf32> to vector<1x8xf32>
    %96 = vector.shape_cast %95 : vector<1x8xf32> to vector<1x8x1xf32>
    %97 = vector.broadcast %96 : vector<1x8x1xf32> to vector<1x8x8xf32>
    %98 = arith.divf %94, %97 : vector<1x8x8xf32>
    %cst_35 = arith.constant dense<0.000000e+00> : vector<1x8x8xf32>
    %99 = tpu.matmul %98, %86, %cst_35 {dimension_numbers = #tpu.dot_dimension_numbers<[2], [1], [1], [2], [0, 0, 0, 1, 1, 2], [0], [0]>} : vector<1x8x8xf32>, vector<1x8x8xf32>, vector<1x8x8xf32> -> vector<1x8x8xf32>
    %c24 = arith.constant 24 : index
    %c0_36 = arith.constant 0 : index
    %100 = vector.load %arg3[%c24, %c0_36] : memref<160x32xf32, #tpu.memory_space<vmem>>, vector<8x32xf32>
    %101 = vector.shape_cast %99 : vector<1x8x8xf32> to vector<8x8xf32>
    %cst_37 = arith.constant dense<0.000000e+00> : vector<8x32xf32>
    %102 = tpu.matmul %101, %100, %cst_37 {dimension_numbers = #tpu.dot_dimension_numbers<[1], [0], [0], [1], [0, 0, 1, 1], [], []>} : vector<8x8xf32>, vector<8x32xf32>, vector<8x32xf32> -> vector<8x32xf32>
    %103 = arith.addf %80, %102 : vector<8x32xf32>
    %c0_38 = arith.constant 0 : index
    %c0_39 = arith.constant 0 : index
    %104 = vector.load %arg5[%c0_38, %c0_39] : memref<48x32xf32, #tpu.memory_space<vmem>>, vector<1x32xf32>
    %105 = vector.broadcast %104 : vector<1x32xf32> to vector<8x32xf32>
    %106 = arith.addf %103, %105 : vector<8x32xf32>
    %107 = arith.addf %6, %106 : vector<8x32xf32>
    %c8_40 = arith.constant 8 : index
    %c0_41 = arith.constant 0 : index
    %108 = vector.load %arg5[%c8_40, %c0_41] : memref<48x32xf32, #tpu.memory_space<vmem>>, vector<1x32xf32>
    %c16_42 = arith.constant 16 : index
    %c0_43 = arith.constant 0 : index
    %109 = vector.load %arg5[%c16_42, %c0_43] : memref<48x32xf32, #tpu.memory_space<vmem>>, vector<1x32xf32>
    %cst_44 = arith.constant dense<0.000000e+00> : vector<8xf32>
    %110 = vector.multi_reduction <add>, %107, %cst_44 [1] : vector<8x32xf32> to vector<8xf32>
    %111 = vector.shape_cast %110 : vector<8xf32> to vector<8x1xf32>
    %cst_45 = arith.constant 3.200000e+01 : f32
    %112 = vector.broadcast %cst_45 : f32 to vector<8x1xf32>
    %113 = arith.divf %111, %112 : vector<8x1xf32>
    %114 = vector.broadcast %113 : vector<8x1xf32> to vector<8x32xf32>
    %115 = arith.subf %107, %114 : vector<8x32xf32>
    %116 = arith.mulf %115, %115 : vector<8x32xf32>
    %cst_46 = arith.constant dense<0.000000e+00> : vector<8xf32>
    %117 = vector.multi_reduction <add>, %116, %cst_46 [1] : vector<8x32xf32> to vector<8xf32>
    %118 = vector.shape_cast %117 : vector<8xf32> to vector<8x1xf32>
    %cst_47 = arith.constant 0.0322580636 : f32
    %119 = vector.broadcast %cst_47 : f32 to vector<8x1xf32>
    %120 = arith.mulf %118, %119 : vector<8x1xf32>
    %121 = vector.broadcast %113 : vector<8x1xf32> to vector<8x32xf32>
    %122 = arith.subf %107, %121 : vector<8x32xf32>
    %123 = vector.broadcast %108 : vector<1x32xf32> to vector<8x32xf32>
    %124 = arith.mulf %123, %122 : vector<8x32xf32>
    %125 = math.sqrt %120 : vector<8x1xf32>
    %cst_48 = arith.constant 9.99999997E-7 : f32
    %126 = vector.broadcast %cst_48 : f32 to vector<8x1xf32>
    %127 = arith.addf %125, %126 : vector<8x1xf32>
    %128 = vector.broadcast %127 : vector<8x1xf32> to vector<8x32xf32>
    %129 = arith.divf %124, %128 : vector<8x32xf32>
    %130 = vector.broadcast %109 : vector<1x32xf32> to vector<8x32xf32>
    %131 = arith.addf %129, %130 : vector<8x32xf32>
    %cst_49 = arith.constant dense<0.000000e+00> : vector<8x128xf32>
    %132 = tpu.matmul %131, %1, %cst_49 {dimension_numbers = #tpu.dot_dimension_numbers<[1], [0], [0], [1], [0, 0, 1, 1], [], []>} : vector<8x32xf32>, vector<32x128xf32>, vector<8x128xf32> -> vector<8x128xf32>
    %133 = vector.broadcast %3 : vector<1x128xf32> to vector<8x128xf32>
    %134 = arith.addf %132, %133 : vector<8x128xf32>
    %cst_50 = arith.constant 0.000000e+00 : f32
    %135 = vector.broadcast %cst_50 : f32 to vector<8x128xf32>
    %136 = arith.maximumf %134, %135 : vector<8x128xf32>
    %cst_51 = arith.constant dense<0.000000e+00> : vector<8x32xf32>
    %137 = tpu.matmul %136, %4, %cst_51 {dimension_numbers = #tpu.dot_dimension_numbers<[1], [0], [0], [1], [0, 0, 1, 1], [], []>} : vector<8x128xf32>, vector<128x32xf32>, vector<8x32xf32> -> vector<8x32xf32>
    %c24_52 = arith.constant 24 : index
    %c0_53 = arith.constant 0 : index
    %138 = vector.load %arg5[%c24_52, %c0_53] : memref<48x32xf32, #tpu.memory_space<vmem>>, vector<1x32xf32>
    %139 = vector.broadcast %138 : vector<1x32xf32> to vector<8x32xf32>
    %140 = arith.addf %137, %139 : vector<8x32xf32>
    %141 = arith.addf %131, %140 : vector<8x32xf32>
    %c32_54 = arith.constant 32 : index
    %c0_55 = arith.constant 0 : index
    %142 = vector.load %arg5[%c32_54, %c0_55] : memref<48x32xf32, #tpu.memory_space<vmem>>, vector<1x32xf32>
    %c40 = arith.constant 40 : index
    %c0_56 = arith.constant 0 : index
    %143 = vector.load %arg5[%c40, %c0_56] : memref<48x32xf32, #tpu.memory_space<vmem>>, vector<1x32xf32>
    %cst_57 = arith.constant dense<0.000000e+00> : vector<8xf32>
    %144 = vector.multi_reduction <add>, %141, %cst_57 [1] : vector<8x32xf32> to vector<8xf32>
    %145 = vector.shape_cast %144 : vector<8xf32> to vector<8x1xf32>
    %cst_58 = arith.constant 3.200000e+01 : f32
    %146 = vector.broadcast %cst_58 : f32 to vector<8x1xf32>
    %147 = arith.divf %145, %146 : vector<8x1xf32>
    %148 = vector.broadcast %147 : vector<8x1xf32> to vector<8x32xf32>
    %149 = arith.subf %141, %148 : vector<8x32xf32>
    %150 = arith.mulf %149, %149 : vector<8x32xf32>
    %cst_59 = arith.constant dense<0.000000e+00> : vector<8xf32>
    %151 = vector.multi_reduction <add>, %150, %cst_59 [1] : vector<8x32xf32> to vector<8xf32>
    %152 = vector.shape_cast %151 : vector<8xf32> to vector<8x1xf32>
    %cst_60 = arith.constant 0.0322580636 : f32
    %153 = vector.broadcast %cst_60 : f32 to vector<8x1xf32>
    %154 = arith.mulf %152, %153 : vector<8x1xf32>
    %155 = vector.broadcast %147 : vector<8x1xf32> to vector<8x32xf32>
    %156 = arith.subf %141, %155 : vector<8x32xf32>
    %157 = vector.broadcast %142 : vector<1x32xf32> to vector<8x32xf32>
    %158 = arith.mulf %157, %156 : vector<8x32xf32>
    %159 = math.sqrt %154 : vector<8x1xf32>
    %cst_61 = arith.constant 9.99999997E-7 : f32
    %160 = vector.broadcast %cst_61 : f32 to vector<8x1xf32>
    %161 = arith.addf %159, %160 : vector<8x1xf32>
    %162 = vector.broadcast %161 : vector<8x1xf32> to vector<8x32xf32>
    %163 = arith.divf %158, %162 : vector<8x32xf32>
    %164 = vector.broadcast %143 : vector<1x32xf32> to vector<8x32xf32>
    %165 = arith.addf %163, %164 : vector<8x32xf32>
    %166 = vector.shape_cast %165 : vector<8x32xf32> to vector<1x8x32xf32>
    %c0_62 = arith.constant 0 : index
    %c0_63 = arith.constant 0 : index
    %c0_64 = arith.constant 0 : index
    %167 = vector.load %arg6[%c0_62, %c0_63, %c0_64] : memref<1x8x32xf32, #tpu.memory_space<vmem>>, vector<1x8x32xf32>
    tpu.vector_store %arg6[%c0_62, %c0_63, %c0_64], %166 {strides = array<i32>} : memref<1x8x32xf32, #tpu.memory_space<vmem>>, vector<1x8x32xf32>,
    return
  }
  func.func @transform_0(%arg0: i32) -> (i32, i32, i32) {
    %c0_i32 = arith.constant 0 : i32
    %c0_i32_0 = arith.constant 0 : i32
    %c0_i32_1 = arith.constant 0 : i32
    return %arg0, %c0_i32, %c0_i32_0 : i32, i32, i32
  }
  func.func @transform_1(%arg0: i32) -> (i32, i32, i32) {
    %c0_i32 = arith.constant 0 : i32
    %c0_i32_0 = arith.constant 0 : i32
    %c0_i32_1 = arith.constant 0 : i32
    return %arg0, %c0_i32, %c0_i32_0 : i32, i32, i32
  }
  func.func @transform_2(%arg0: i32) -> (i32, i32) {
    %c0_i32 = arith.constant 0 : i32
    %c0_i32_0 = arith.constant 0 : i32
    %c0_i32_1 = arith.constant 0 : i32
    return %c0_i32, %c0_i32_0 : i32, i32
  }
  func.func @transform_3(%arg0: i32) -> (i32, i32) {
    %c0_i32 = arith.constant 0 : i32
    %c0_i32_0 = arith.constant 0 : i32
    %c0_i32_1 = arith.constant 0 : i32
    return %c0_i32, %c0_i32_0 : i32, i32
  }
  func.func @transform_4(%arg0: i32) -> (i32, i32) {
    %c0_i32 = arith.constant 0 : i32
    %c0_i32_0 = arith.constant 0 : i32
    %c0_i32_1 = arith.constant 0 : i32
    return %c0_i32, %c0_i32_0 : i32, i32
  }
  func.func @transform_5(%arg0: i32) -> (i32, i32, i32) {
    %c0_i32 = arith.constant 0 : i32
    %c0_i32_0 = arith.constant 0 : i32
    %c0_i32_1 = arith.constant 0 : i32
    return %arg0, %c0_i32, %c0_i32_0 : i32, i32, i32
  }
}

</mosaic_0001>

<bundles_post_ra>
// kernel: tpu_custom_call.1
= control target key start
LH: loop header
LB: loop body
LE: loop exit
PB: predicated region body
PF: predicated region fallthrough
CT: control target
= control target key end

     0   :  { %10 = vsyncpa [#allocation3], 0  ;;  %s2364_s0 = inlined_call_operand.vmem [shape: f32[2,8,32], index: 0, kind: input, shape index: {}]   ;;  %s2365_s1 = inlined_call_operand.vmem [shape: f32[2,1,8], index: 1, kind: input, shape index: {}]   ;;  %s2366_s2 = inlined_call_operand.vmem [shape: f32[160,32], index: 2, kind: input, shape index: {}]   ;;  %s2367_s3 = inlined_call_operand.vmem [shape: f32[80,128], index: 3, kind: input, shape index: {}]   ;;  %s2368_s4 = inlined_call_operand.vmem [shape: f32[48,32], index: 4, kind: input, shape index: {}]   ;;  %s2369_s5 = inlined_call_operand.hbm [shape: f32[2,8,32], index: 5, kind: output, shape index: {}]  }
   0x1   :  { %12 = vsyncpa [#allocation3 + $0x1], 0  ;;  %s2040_s18 = smov 0   ;;  %s2042_s19 = smov 0  }
   0x2   :  { %s2044_s20 = smov 0   ;;  %s2046_s21 = smov 0  }
   0x3 LB: > { %s2061_s22 = sadd.s32 4294967295, %s1993_s21   ;;  %s1613_s23 = sadd.s32 4294967294, %s1993_s21   ;;  %s1993_s21 = sphi %s2046_s21, %s2375_s21   ;;  %s1989_s20 = sphi %s2044_s20, %s2374_s20   ;;  %s1985_s19 = sphi %s2042_s19, %s2373_s19   ;;  %s1981_s18 = sphi %s2040_s18, %s2372_s18  }
   0x4   : > { %s2065_s24 = sadd.s32 1, %s1993_s21   ;;  %s140_s25 = sadd.s32 1, %s1989_s20 }
   0x5   : > { %s137_s26 = ssub.s32 %s1993_s21, %s2065_s24  ;;  %p150_p0 = scmp.ne.s32.totalorder %s1989_s20, %s1985_s19 }
   0x6   : > { %p138_p1 = scmp.eq.s32.totalorder %s137_s26, 0  ;;  %p151_p2 = scmp.eq.s32.totalorder %s2061_s22, 1 }
   0x7   : > { %p156_p3 = scmp.ne.s32.totalorder %s1985_s19, %s1981_s18  ;;  %p157_p4 = scmp.eq.s32.totalorder %s1613_s23, 1 }
   0x8   : > { %s2076_s27 = scalar_select %p138_p1, %s1989_s20, %s140_s25  }
   0x9   : > { %p2078_p5 = por %p151_p2, %p150_p0  ;;  %p2082_p6 = por %p157_p4, %p156_p3 }
   0xa   : > { %p1616_p7 = scmp.ge.s32.totalorder %s1993_s21, 1  ;;  %p197_p8 = scmp.lt.s32.totalorder %s1993_s21, 3 }
   0xc   : > { %p198_p9 = pnand %p1616_p7, %p197_p8 }
   0xd   : > { %v234_v0 = vld [vmem:[%s2367_s3] sm:$0xff] (!%p198_p9)  ;;  %v235_v1 = vld [vmem:[%s2367_s3 + $0x8] sm:$0xff] (!%p198_p9)  ;;  %v236_v2 = vld [vmem:[%s2367_s3 + $0x10] sm:$0xff] (!%p198_p9)  ;;  %v1995_v3 = vmov (!%p198_p9), 0.0|0.0   ;;  %vm1996_vm0 = vmmov (!%p198_p9), 0   ;;  %v1997_v6 = vmov (!%p198_p9), 0.0  }
   0xe   : > { %201 = sbr.rel (%p198_p9) target bundleno = 4222 (0x107e), region = 40  ;;  %1818 = vmatprep.subr.bf16.mxu0 (!%p198_p9), %v1995_v3  ;;  %v1819_v4 = vpack.c.bf16 (!%p198_p9), %v235_v1, %v234_v0  ;;  %v237_v5 = vld [vmem:[%s2367_s3 + $0x18] sm:$0xff] (!%p198_p9)  ;;  %1709 = vmatprep.mubr.msk.f32.mxu0 (!%p198_p9), %vm1996_vm0, %v1997_v6  ;;  %p227_p10 = scmp.lt.s32.totalorder (!%p198_p9), %s2061_s22, 1  ;;  %vm265_vm1 = vcmask (!%p198_p9), 261120   ;;  %v1619_v9 = vld [vmem:[%s2367_s3 + $0x40] ss:$0 sm:$0xff] (!%p198_p9) }
   0xf   : > { %1737 = vmatprep.subr.mxu1 (!%p198_p9), %v1997_v6  ;;  %1739 = vmatprep.mubr.msk.f32.mxu1 (!%p198_p9), %vm1996_vm0, %v1997_v6  ;;  %v1822_v7 = vpack.c.bf16 (!%p198_p9), %v237_v5, %v236_v2  ;;  %s1998_s26 = smov (!%p198_p9), 64   ;;  %s1999_s30 = smov (!%p198_p9), 96   ;;  %vm349_vm2 = vcmask (!%p198_p9), 64512   ;;  %v511_v30 = vld [vmem:[%s2366_s2] sm:$0xff] (!%p198_p9)  ;;  %v677_v48 = vld [vmem:[%s2366_s2 + $0x8] sm:$0xff] (!%p198_p9) }
  0x10   : > { %1820 = vmatpush3.bf16.msra.mxu0 (!%p198_p9), %v1819_v4  ;;  %s2000_s6 = smov (!%p198_p9), 88   ;;  %s2001_s10 = smov (!%p198_p9), 120   ;;  %1738 = vmatpush3.msra.mxu1 (!%p198_p9), %v511_v30 }
  0x11   : > { %1821 = vmatprep.subr.bf16.mxu0 (!%p198_p9), %v1995_v3  ;;  %1747 = vmatprep.subr.mxu1 (!%p198_p9), %v1997_v6  ;;  %s2004_s15 = smov (!%p198_p9), 112   ;;  %s2005_s23 = smov (!%p198_p9), 48  }
  0x12   : > { %s2006_s25 = smov (!%p198_p9), 72   ;;  %s2008_s7 = smov (!%p198_p9), 40  }
  0x13   : > { %s224_s12 = sand.u32 (!%p198_p9), 1, %s1985_s19  }
  0x14   : > { %1823 = vmatpush3.bf16.msra.mxu0 (!%p198_p9), %v1822_v7  ;;  %s1532_s8 = scalar_lea.sflag (!%p198_p9), [#allocation3], %s224_s12 }
  0x15   : > { %s2108_s13 = scalar_select %p227_p10, %s2061_s22, 1  ;;  %1712 = vmatprep.subr.mxu0 %v1997_v6 }
  0x17   : > { %s1618_s14 = sshll.u32 %s2108_s13, 3  ;;  %s233_s9 = scalar_lea.vmem %s2365_s1, %s2108_s13 }
  0x18   : > { %s230_s17 = scalar_lea.vmem %s2364_s0, %s1618_s14  ;;  %v2141_v15 = vld [vmem:[%s233_s9] ss:$0 sm:$0xff]  ;;  %s2002_s13 = smov 56  }
  0x19   : > { %v2115_v8 = vld [vmem:[%s230_s17] sm:$0xff]  ;;  %s2003_s14 = smov 80  }
  0x1a   : > { %1710 = vmatmul.mubr.msk.f32.vlgmr.msra.gmra.mrb[0].mxu0 %vm265_vm1, %v2115_v8 }
  0x1b   : > { %1714 = vmatprep.mubr.msk.f32.mxu0 %vm1996_vm0, %v1997_v6 }
  0xed   : > { %v335_v10 = vpop.f32.mrb[0].mxu0 }
  0xee   : > { %v2125_v11 = vadd.f32 %v1619_v9, %v335_v10  ;;  %v1711_v12 = vpop.f32.mrb[1].mxu0  ;;  %v989_v10 = vld [vmem:[%s2366_s2 + $0x10] sm:$0xff] }
  0xf0   : > { %435 = vrot.lane.b32.xlu1 %v2125_v11, %s1998_s26  ;;  %347 = vrot.lane.b32.xlu0 %v2125_v11, %s1999_s30  ;;  %s2007_s26 = smov 104  }
  0xf4   : > { %514 = vrot.lane.b32.xlu1 %v2125_v11, %s2000_s6 }
 0x162   : > { %v348_v13 = vpop.permute.xlu0 %347  ;;  %v436_v14 = vpop.permute.xlu1 %435 }
 0x163   : > { %1713 = vmatpush3.xpose.msk.msra.mxu0 %vm349_vm2, %v348_v13 }
 0x164   : > { %1717 = vmatprep.subr.mxu0 %v1997_v6 }
 0x166   : > { %1715 = vmatmul.mubr.msk.f32.vlgmr.msra.gmra.mrb[2].mxu0 %vm349_vm2, %v2125_v11  ;;  %v515_v25 = vpop.permute.xlu1 %514 }
 0x167   : > { %1718 = vmatpush3.msra.mxu0 %v436_v14  ;;  %1719 = vmatprep.mubr.msk.f32.mxu0 %vm1996_vm0, %v1997_v6 }
 0x168   : > { %1722 = vmatprep.subr.mxu0 %v1997_v6 }
 0x239   : > { %v420_v16 = vpop.f32.mrb[2].mxu0 }
 0x23a   : > { %v421_v17 = vadd.f32 %v2141_v15, %v420_v16  ;;  %v1716_v18 = vpop.f32.mrb[3].mxu0 }
 0x23c   : > { %v424_v19 = vsel %vm349_vm2, %v421_v17, -inf }
 0x23d   : > { %425 = vmax.xlane.f32.xlu0 %v424_v19 }
 0x2ca   : > { %v426_v20 = vpop.xlane.xlu0 %425 }
 0x2cb   : > { %v427_v21 = vsub.f32 %v421_v17, %v426_v20 }
 0x2cd   : > { %v428_v22 = vmul.f32 1.442695, %v427_v21 }
 0x2cf   : > { %1907 = vpow2.f32 %v428_v22 }
 0x2d9   : > { %v1908_v23 = vpop.eup %1907 }
 0x2da   : > { %v430_v24 = vsel %vm349_vm2, %v1908_v23, 0.0 }
 0x2db   : > { %431 = vadd.xlane.f32.xlu1 %v430_v24  ;;  %v1229_v24 = vld [vmem:[%s2366_s2 + $0x18] sm:$0xff] }
 0x2ec   : > { %512 = vrot.lane.b32.xlu1 %v2125_v11, %s2001_s10 }
 0x368   : > { %v432_v26 = vpop.xlane.xlu1 %431 }
 0x369   : > { %1909 = vrcp.f32 %v432_v26 }
 0x36c   : > { %v513_v29 = vpop.permute.xlu1 %512 }
 0x373   : > { %v1910_v27 = vpop.eup %1909 }
 0x374   : > { %v434_v28 = vmul.f32 %v1910_v27, %v1908_v23 }
 0x376   : > { %1720 = vmatmul.mubr.msk.f32.vlgmr.msra.gmra.mrb[4].mxu0 %vm349_vm2, %v434_v28 }
 0x377   : > { %1723 = vmatpush3.xpose.msk.msra.mxu0 %vm349_vm2, %v515_v25  ;;  %1724 = vmatprep.mubr.msk.f32.mxu0 %vm1996_vm0, %v1997_v6 }
 0x378   : > { %1727 = vmatprep.subr.mxu0 %v1997_v6 }
 0x37a   : > { %1725 = vmatmul.mubr.msk.f32.vlgmr.msra.gmra.mrb[6].mxu0 %vm349_vm2, %v513_v29 }
 0x37b   : > { %1729 = vmatprep.mubr.msk.f32.mxu0 %vm1996_vm0, %v1997_v6 }
 0x449   : > { %v507_v31 = vpop.f32.mrb[4].mxu0 }
 0x44a   : > { %v1721_v32 = vpop.f32.mrb[5].mxu0  ;;  %1740 = vmatmul.mubr.msk.f32.vlgmr.msra.gmra.mrb[0].mxu1 %vm349_vm2, %v507_v31 }
 0x44b   : > { %1749 = vmatprep.mubr.msk.f32.mxu1 %vm1996_vm0, %v1997_v6 }
 0x44d   : > { %v586_v33 = vpop.f32.mrb[6].mxu0 }
 0x44e   : > { %v587_v34 = vadd.f32 %v2141_v15, %v586_v33  ;;  %v1726_v35 = vpop.f32.mrb[7].mxu0  ;;  %v1638_v33 = vld [vmem:[%s2368_s4] ss:$0 sm:$0xff] }
 0x450   : > { %v590_v36 = vsel %vm349_vm2, %v587_v34, -inf }
 0x451   : > { %591 = vmax.xlane.f32.xlu1 %v590_v36 }
 0x4de   : > { %v592_v37 = vpop.xlane.xlu1 %591 }
 0x4df   : > { %v593_v38 = vsub.f32 %v587_v34, %v592_v37 }
 0x4e1   : > { %v594_v39 = vmul.f32 1.442695, %v593_v38 }
 0x4e3   : > { %1911 = vpow2.f32 %v594_v39 }
 0x4ed   : > { %v1912_v40 = vpop.eup %1911 }
 0x4ee   : > { %v596_v41 = vsel %vm349_vm2, %v1912_v40, 0.0 }
 0x4ef   : > { %597 = vadd.xlane.f32.xlu0 %v596_v41 }
 0x505   : > { %601 = vrot.lane.b32.xlu0 %v2125_v11, %s2002_s13  ;;  %s1617_s13 = sshll.u32 %s224_s12, 3 }
 0x509   : > { %826 = vrot.lane.b32.xlu0 %v2125_v11, %s2003_s14 }
 0x50d   : > { %824 = vrot.lane.b32.xlu0 %v2125_v11, %s2004_s15 }
 0x51d   : > { %v820_v42 = vpop.f32.mrb[0].mxu1 }
 0x51e   : > { %v1741_v43 = vpop.f32.mrb[1].mxu1 }
 0x57c   : > { %v598_v44 = vpop.xlane.xlu0 %597 }
 0x57d   : > { %1913 = vrcp.f32 %v598_v44  ;;  %v239_v44 = vld [vmem:[%s2367_s3 + $0x28] sm:$0xff] }
 0x580   : > { %v602_v45 = vpop.permute.xlu0 %601 }
 0x581   : > { %1728 = vmatpush3.msra.mxu0 %v602_v45 }
 0x582   : > { %1732 = vmatprep.subr.mxu0 %v1997_v6 }
 0x584   : > { %v827_v49 = vpop.permute.xlu0 %826 }
 0x587   : > { %v1914_v46 = vpop.eup %1913 }
 0x588   : > { %v600_v47 = vmul.f32 %v1914_v46, %v1912_v40  ;;  %v825_v52 = vpop.permute.xlu0 %824  ;;  %v241_v46 = vld [vmem:[%s2367_s3 + $0x38] sm:$0xff] }
 0x58a   : > { %1730 = vmatmul.mubr.msk.f32.vlgmr.msra.gmra.mrb[8].mxu0 %vm349_vm2, %v600_v47 }
 0x58b   : > { %1733 = vmatpush3.msra.mxu0 %v677_v48  ;;  %1734 = vmatprep.mubr.msk.f32.mxu0 %vm1996_vm0, %v1997_v6  ;;  %v244_v48 = vld [vmem:[%s2366_s2 + $0x20] sm:$0xff] }
 0x58c   : > { %1742 = vmatprep.subr.mxu0 %v1997_v6 }
 0x65d   : > { %v673_v50 = vpop.f32.mrb[8].mxu0 }
 0x65e   : > { %v1731_v51 = vpop.f32.mrb[9].mxu0  ;;  %1735 = vmatmul.mubr.msk.f32.vlgmr.msra.gmra.mrb[10].mxu0 %vm349_vm2, %v673_v50  ;;  %v246_v50 = vld [vmem:[%s2366_s2 + $0x30] sm:$0xff] }
 0x65f   : > { %1743 = vmatpush3.xpose.msk.msra.mxu0 %vm349_vm2, %v827_v49  ;;  %1744 = vmatprep.mubr.msk.f32.mxu0 %vm1996_vm0, %v1997_v6  ;;  %v245_v49 = vld [vmem:[%s2366_s2 + $0x28] sm:$0xff] }
 0x660   : > { %1752 = vmatprep.subr.mxu0 %v1997_v6  ;;  %v1831_v51 = vpack.c.bf16 %v245_v49, %v244_v48  ;;  %v1645_v49 = vld [vmem:[%s2368_s4 + $0x28] ss:$0 sm:$0xff] }
 0x662   : > { %1745 = vmatmul.mubr.msk.f32.vlgmr.msra.gmra.mrb[12].mxu0 %vm349_vm2, %v825_v52  ;;  %v247_v52 = vld [vmem:[%s2366_s2 + $0x38] sm:$0xff] }
 0x663   : > { %1754 = vmatprep.mubr.msk.f32.mxu0 %vm1996_vm0, %v1997_v6  ;;  %1753 = vmatpush3.msra.mxu0 %v989_v10 }
 0x664   : > { %1762 = vmatprep.subr.mxu0 %v1997_v6 }
 0x731   : > { %v747_v53 = vpop.f32.mrb[10].mxu0 }
 0x732   : > { %v821_v54 = vadd.f32 %v820_v42, %v747_v53  ;;  %v1736_v55 = vpop.f32.mrb[11].mxu0  ;;  %v1834_v53 = vpack.c.bf16 %v247_v52, %v246_v50 }
 0x733   : > { %v249_v55 = vld [vmem:[%s2366_s2 + $0x48] sm:$0xff] }
 0x735   : > { %v898_v56 = vpop.f32.mrb[12].mxu0 }
 0x736   : > { %v899_v57 = vadd.f32 %v2141_v15, %v898_v56  ;;  %v1746_v58 = vpop.f32.mrb[13].mxu0 }
 0x737   : > { %v251_v58 = vld [vmem:[%s2366_s2 + $0x58] sm:$0xff] }
 0x738   : > { %v902_v59 = vsel %vm349_vm2, %v899_v57, -inf }
 0x739   : > { %903 = vmax.xlane.f32.xlu1 %v902_v59 }
 0x74a   : > { %913 = vrot.lane.b32.xlu1 %v2125_v11, %s2005_s23  ;;  %s1647_s23 = sshll.u32 %s2061_s22, 7  ;;  %s2009_s22 = smov [#allocation2]  }
 0x74b   : > { %s1935_s10 = sshll.u32 %s2009_s22, 4  ;;  %s1936_s10 = int_to_ptr.vmem [resolvable:$false] %s1935_s10 }
 0x74c   : > { %s1937_s11 = scalar_lea.vmem %s1936_s10, 256 }
 0x74e   : > { %1066 = vrot.lane.b32.xlu1 %v2125_v11, %s2006_s25  ;;  %s226_s25 = scalar_lea.vmem [#allocation2], %s1617_s13 }
 0x752   : > { %1064 = vrot.lane.b32.xlu1 %v2125_v11, %s2007_s26  ;;  %s1545_s26 = sshll.u32 %s226_s25, 4  ;;  %s2323_s26 = int_to_ptr.vmem [resolvable:$true] %s1545_s26 }
 0x753   : > { %s1931_s9 = scalar_lea.vmem %s2323_s26, 128  ;;  %p1938_p0 = scmp.lt.s32.totalorder %s2323_s26, %s1936_s10 }
 0x754   : > { %p1932_p11 = scmp.ne.s32.totalorder %s2323_s26, %s1931_s9  ;;  %p1939_p1 = scmp.lt.s32.totalorder %s1937_s11, %s1931_s9 }
 0x756   : > { %p1933_p12 = pnand %p1932_p11, %p2078_p5  ;;  %p1940_p2 = por %p1939_p1, %p1938_p0 }
 0x758   : > { %p1934_p13 = pneg %p1933_p12 }
 0x75a   : > { %p1941_p3 = pnand %p1940_p2, %p1934_p13 }
 0x7c6   : > { %v904_v60 = vpop.xlane.xlu1 %903 }
 0x7c7   : > { %v905_v61 = vsub.f32 %v899_v57, %v904_v60  ;;  %v250_v57 = vld [vmem:[%s2366_s2 + $0x50] sm:$0xff]  ;;  %v252_v60 = vld [vmem:[%s2366_s2 + $0x60] sm:$0xff] }
 0x7c8   : > { %v1840_v59 = vpack.c.bf16 %v251_v58, %v250_v57 }
 0x7c9   : > { %v906_v62 = vmul.f32 1.442695, %v905_v61  ;;  %v253_v61 = vld [vmem:[%s2366_s2 + $0x68] sm:$0xff] }
 0x7ca   : > { %v914_v63 = vpop.permute.xlu1 %913 }
 0x7cb   : > { %1915 = vpow2.f32 %v906_v62  ;;  %1748 = vmatpush3.msra.mxu1 %v914_v63  ;;  %v1843_v62 = vpack.c.bf16 %v253_v61, %v252_v60  ;;  %v254_v63 = vld [vmem:[%s2366_s2 + $0x70] sm:$0xff] }
 0x7cc   : > { %1757 = vmatprep.subr.mxu1 %v1997_v6 }
 0x7ce   : > { %v1067_v5 = vpop.permute.xlu1 %1066 }
 0x7d2   : > { %v1065_v9 = vpop.permute.xlu1 %1064 }
 0x7d5   : > { %v1916_v0 = vpop.eup %1915 }
 0x7d6   : > { %v908_v1 = vsel %vm349_vm2, %v1916_v0, 0.0 }
 0x7d7   : > { %909 = vadd.xlane.f32.xlu0 %v908_v1 }
 0x864   : > { %v910_v2 = vpop.xlane.xlu0 %909 }
 0x865   : > { %1917 = vrcp.f32 %v910_v2  ;;  %v256_v2 = vld [vmem:[%s2366_s2 + $0x80] sm:$0xff] }
 0x86f   : > { %v1918_v4 = vpop.eup %1917 }
 0x870   : > { %v912_v7 = vmul.f32 %v1918_v4, %v1916_v0  ;;  %v255_v0 = vld [vmem:[%s2366_s2 + $0x78] sm:$0xff]  ;;  %v257_v4 = vld [vmem:[%s2366_s2 + $0x88] sm:$0xff] }
 0x871   : > { %v1846_v1 = vpack.c.bf16 %v255_v0, %v254_v63 }
 0x872   : > { %1750 = vmatmul.mubr.msk.f32.vlgmr.msra.gmra.mrb[2].mxu1 %vm349_vm2, %v912_v7 }
 0x873   : > { %1758 = vmatpush3.xpose.msk.msra.mxu1 %vm349_vm2, %v1067_v5  ;;  %1759 = vmatprep.mubr.msk.f32.mxu1 %vm1996_vm0, %v1997_v6  ;;  %v1849_v5 = vpack.c.bf16 %v257_v4, %v256_v2 }
 0x874   : > { %1767 = vmatprep.subr.mxu1 %v1997_v6 }
 0x876   : > { %1760 = vmatmul.mubr.msk.f32.vlgmr.msra.gmra.mrb[4].mxu1 %vm349_vm2, %v1065_v9 }
 0x877   : > { %1769 = vmatprep.mubr.msk.f32.mxu1 %vm1996_vm0, %v1997_v6  ;;  %1768 = vmatpush3.msra.mxu1 %v1229_v24  ;;  %v259_v24 = vld [vmem:[%s2366_s2 + $0x98] sm:$0xff] }
 0x878   : > { %1830 = vmatprep.subr.bf16.mxu1 %v1995_v3 }
 0x945   : > { %v985_v12 = vpop.f32.mrb[2].mxu1 }
 0x946   : > { %v1751_v13 = vpop.f32.mrb[3].mxu1  ;;  %1755 = vmatmul.mubr.msk.f32.vlgmr.msra.gmra.mrb[14].mxu0 %vm349_vm2, %v985_v12 }
 0x947   : > { %1764 = vmatprep.mubr.msk.f32.mxu0 %vm1996_vm0, %v1997_v6 }
 0x949   : > { %v1138_v14 = vpop.f32.mrb[4].mxu1 }
 0x94a   : > { %v1139_v16 = vadd.f32 %v2141_v15, %v1138_v14  ;;  %v1761_v17 = vpop.f32.mrb[5].mxu1 }
 0x94c   : > { %v1142_v18 = vsel %vm349_vm2, %v1139_v16, -inf }
 0x94d   : > { %1143 = vmax.xlane.f32.xlu1 %v1142_v18  ;;  %v1639_v18 = vld [vmem:[%s2368_s4 + $0x8] ss:$0 sm:$0xff] }
 0x9da   : > { %v1144_v19 = vpop.xlane.xlu1 %1143 }
 0x9db   : > { %v1145_v20 = vsub.f32 %v1139_v16, %v1144_v19 }
 0x9dd   : > { %v1146_v21 = vmul.f32 1.442695, %v1145_v20 }
 0x9df   : > { %1919 = vpow2.f32 %v1146_v21 }
 0x9e9   : > { %v1920_v22 = vpop.eup %1919 }
 0x9ea   : > { %v1148_v23 = vsel %vm349_vm2, %v1920_v22, 0.0 }
 0x9eb   : > { %1149 = vadd.xlane.f32.xlu0 %v1148_v23  ;;  %v258_v23 = vld [vmem:[%s2366_s2 + $0x90] sm:$0xff] }
 0xa01   : > { %1153 = vrot.lane.b32.xlu0 %v2125_v11, %s2008_s7  ;;  %s2321_s7 = scalar_lea.hbm %s2369_s5, %s1647_s23 }
 0xa19   : > { %v1059_v15 = vpop.f32.mrb[14].mxu0 }
 0xa1a   : > { %v1063_v25 = vadd.f32 %v1059_v15, %v821_v54  ;;  %v1756_v26 = vpop.f32.mrb[15].mxu0  ;;  %v248_v54 = vld [vmem:[%s2366_s2 + $0x40] sm:$0xff]  ;;  %v1852_v15 = vpack.c.bf16 %v259_v24, %v258_v23 }
 0xa1b   : > { %v1837_v56 = vpack.c.bf16 %v249_v55, %v248_v54 }
 0xa78   : > { %v1150_v27 = vpop.xlane.xlu0 %1149 }
 0xa79   : > { %1921 = vrcp.f32 %v1150_v27 }
 0xa7c   : > { %v1154_v28 = vpop.permute.xlu0 %1153 }
 0xa7d   : > { %1763 = vmatpush3.msra.mxu0 %v1154_v28 }
 0xa7e   : > { %1824 = vmatprep.subr.bf16.mxu0 %v1995_v3 }
 0xa83   : > { %v1922_v29 = vpop.eup %1921 }
 0xa84   : > { %v1152_v30 = vmul.f32 %v1922_v29, %v1920_v22 }
 0xa86   : > { %1765 = vmatmul.mubr.msk.f32.vlgmr.msra.gmra.mrb[16].mxu0 %vm349_vm2, %v1152_v30  ;;  %v1643_v30 = vld [vmem:[%s2368_s4 + $0x18] ss:$0 sm:$0xff] }
 0xa87   : > { %1780 = vmatprep.mubr.msk.f32.mxu0 %vm1996_vm0, %v1997_v6 }
 0xb59   : > { %v1225_v11 = vpop.f32.mrb[16].mxu0 }
 0xb5a   : > { %v1766_v31 = vpop.f32.mrb[17].mxu0  ;;  %1770 = vmatmul.mubr.msk.f32.vlgmr.msra.gmra.mrb[6].mxu1 %vm349_vm2, %v1225_v11 }
 0xb5b   : > { %1815 = vmatprep.mubr.msk.f32.mxu1 %vm1996_vm0, %v1997_v6  ;;  %v238_v6 = vld [vmem:[%s2367_s3 + $0x20] sm:$0xff]  ;;  %1832 = vmatpush3.bf16.msra.mxu1 %v1831_v51 }
 0xb5c   : > { %v1825_v45 = vpack.c.bf16 %v239_v44, %v238_v6  ;;  %1833 = vmatprep.subr.bf16.mxu1 %v1995_v3 }
 0xb5e   : > { %1826 = vmatpush3.bf16.msra.mxu0 %v1825_v45 }
 0xb5f   : > { %1827 = vmatprep.subr.bf16.mxu0 %v1995_v3  ;;  %1835 = vmatpush3.bf16.msra.mxu1 %v1834_v53 }
 0xb60   : > { %1836 = vmatprep.subr.bf16.mxu1 %v1995_v3 }
 0xb63   : > { %1838 = vmatpush3.bf16.msra.mxu1 %v1837_v56 }
 0xb64   : > { %1839 = vmatprep.subr.bf16.mxu1 %v1995_v3 }
 0xb67   : > { %1841 = vmatpush3.bf16.msra.mxu1 %v1840_v59 }
 0xb68   : > { %1842 = vmatprep.subr.bf16.mxu1 %v1995_v3 }
 0xb6b   : > { %1844 = vmatpush3.bf16.msra.mxu1 %v1843_v62 }
 0xb6c   : > { %1845 = vmatprep.subr.bf16.mxu1 %v1995_v3 }
 0xb6f   : > { %1847 = vmatpush3.bf16.msra.mxu1 %v1846_v1 }
 0xb70   : > { %1848 = vmatprep.subr.bf16.mxu1 %v1995_v3 }
 0xb73   : > { %1850 = vmatpush3.bf16.msra.mxu1 %v1849_v5 }
 0xb74   : > { %1851 = vmatprep.subr.bf16.mxu1 %v1995_v3  ;;  %v1640_v3 = vld [vmem:[%s2368_s4 + $0x10] ss:$0 sm:$0xff] }
 0xb77   : > { %1853 = vmatpush3.bf16.msra.mxu1 %v1852_v15 }
 0xc2d   : > { %v1299_v32 = vpop.f32.mrb[6].mxu1 }
 0xc2e   : > { %v1303_v34 = vadd.f32 %v1299_v32, %v1063_v25  ;;  %v1771_v35 = vpop.f32.mrb[7].mxu1  ;;  %v1641_v25 = vld [vmem:[%s2367_s3 + $0x48] ss:$0 sm:$0xff] }
 0xc30   : > { %v1309_v36 = vadd.f32 %v1638_v33, %v1303_v34 }
 0xc32   : > { %v1310_v37 = vadd.f32 %v1309_v36, %v2115_v8  ;;  %v240_v8 = vld [vmem:[%s2367_s3 + $0x30] sm:$0xff] }
 0xc33   : > { %v1828_v47 = vpack.c.bf16 %v241_v46, %v240_v8  ;;  %v1644_v46 = vld [vmem:[%s2368_s4 + $0x20] ss:$0 sm:$0xff] }
 0xc34   : > { %v1313_v38 = vsel %vm265_vm1, %v1310_v37, 0.0 }
 0xc35   : > { %1314 = vadd.xlane.f32.xlu0 %v1313_v38  ;;  %1829 = vmatpush3.bf16.msra.mxu0 %v1828_v47 }
 0xcc2   : > { %v1315_v39 = vpop.xlane.xlu0 %1314 }
 0xcc3   : > { %v1317_v40 = vmul.f32 0.03125, %v1315_v39 }
 0xcc5   : > { %v1318_v41 = vsub.f32 %v1310_v37, %v1317_v40 }
 0xcc7   : > { %v1319_v42 = vmul.f32 %v1318_v41, %v1318_v41  ;;  %v1328_v19 = vmul.f32 %v1639_v18, %v1318_v41 }
 0xcc9   : > { %v1320_v43 = vsel %vm265_vm1, %v1319_v42, 0.0 }
 0xcca   : > { %1321 = vadd.xlane.f32.xlu1 %v1320_v43 }
 0xd57   : > { %v1322_v7 = vpop.xlane.xlu1 %1321 }
 0xd58   : > { %v1323_v9 = vmul.f32 0.032258064, %v1322_v7 }
 0xd5a   : > { %1923 = vrsqrt.f32 %v1323_v9  ;;  %vm1331_vm3 = vcmp.eq.f32.partialorder %v1323_v9, inf  ;;  %v1334_v13 = vand.u32 2147483648, %v1323_v9  ;;  %vm1333_vm4 = vcmp.eq.f32.partialorder %v1323_v9, 0.0 }
 0xd64   : > { %v1924_v10 = vpop.eup %1923 }
 0xd65   : > { %v1330_v12 = vmul.f32 %v1924_v10, %v1323_v9 }
 0xd67   : > { %v1332_v14 = vsel %vm1331_vm3, %v1323_v9, %v1330_v12 }
 0xd68   : > { %v1335_v16 = vsel %vm1333_vm4, %v1334_v13, %v1332_v14 }
 0xd69   : > { %v1336_v17 = vadd.f32 1e-06, %v1335_v16 }
 0xd6b   : > { %1925 = vrcp.f32 %v1336_v17 }
 0xd75   : > { %v1926_v20 = vpop.eup %1925 }
 0xd76   : > { %v1338_v21 = vmul.f32 %v1926_v20, %v1328_v19 }
 0xd78   : > { %v1343_v22 = vadd.f32 %v1640_v3, %v1338_v21 }
 0xd7a   : > { %1781 = vmatmul.mubr.msk.f32.vlgmr.msra.gmra.mrb[18].mxu0 %vm265_vm1, %v1343_v22 }
 0xe4d   : > { %v1417_v26 = vpop.f32.mrb[18].mxu0 }
 0xe4e   : > { %v1418_v27 = vadd.f32 %v1641_v25, %v1417_v26  ;;  %v1782_v28 = vpop.f32.mrb[19].mxu0 }
 0xe50   : > { %v1421_v29 = vmax.f32 %v1418_v27, 0.0 }
 0xe52   : > { %1816 = vmatmul.mubr.f32.vlgmr.msra.gmra.mrb[8].mxu1 %v1421_v29 }
 0xf25   : > { %v1493_v11 = vpop.f32.mrb[8].mxu1 }
 0xf26   : > { %v1494_v31 = vadd.f32 %v1643_v30, %v1493_v11  ;;  %v1817_v32 = vpop.f32.mrb[9].mxu1 }
 0xf28   : > { %v1497_v33 = vadd.f32 %v1494_v31, %v1343_v22 }
 0xf2a   : > { %v1500_v34 = vsel %vm265_vm1, %v1497_v33, 0.0 }
 0xf2b   : > { %1501 = vadd.xlane.f32.xlu1 %v1500_v34 }
 0xfb8   : > { %v1502_v35 = vpop.xlane.xlu1 %1501 }
 0xfb9   : > { %v1503_v36 = vmul.f32 0.03125, %v1502_v35 }
 0xfbb   : > { %v1504_v37 = vsub.f32 %v1497_v33, %v1503_v36 }
 0xfbd   : > { %v1505_v38 = vmul.f32 %v1504_v37, %v1504_v37  ;;  %v1514_v47 = vmul.f32 %v1644_v46, %v1504_v37 }
 0xfbf   : > { %v1506_v39 = vsel %vm265_vm1, %v1505_v38, 0.0 }
 0xfc0   : > { %1507 = vadd.xlane.f32.xlu1 %v1506_v39 }
0x104d   : > { %v1508_v40 = vpop.xlane.xlu1 %1507 }
0x104e   : > { %v1509_v41 = vmul.f32 0.032258064, %v1508_v40 }
0x1050   : > { %1927 = vrsqrt.f32 %v1509_v41  ;;  %vm1517_vm5 = vcmp.eq.f32.partialorder %v1509_v41, inf  ;;  %v1520_v6 = vand.u32 2147483648, %v1509_v41  ;;  %vm1519_vm6 = vcmp.eq.f32.partialorder %v1509_v41, 0.0 }
0x105a   : > { %v1928_v42 = vpop.eup %1927 }
0x105b   : > { %v1516_v43 = vmul.f32 %v1928_v42, %v1509_v41 }
0x105d   : > { %v1518_v44 = vsel %vm1517_vm5, %v1509_v41, %v1516_v43 }
0x105e   : > { %v1521_v8 = vsel %vm1519_vm6, %v1520_v6, %v1518_v44 }
0x105f   : > { %v1522_v45 = vadd.f32 1e-06, %v1521_v8 }
0x1061   : > { %1929 = vrcp.f32 %v1522_v45 }
0x106b   : > { %v1930_v48 = vpop.eup %1929 }
0x106c   : > { %v1524_v50 = vmul.f32 %v1930_v48, %v1514_v47 }
0x106e   : > { %v1529_v51 = vadd.f32 %v1645_v49, %v1524_v50 }
0x1070   : > { %1530 = vst.msk [vmem:[%s226_s25] sm:$0xff] %vm265_vm1, %v1529_v51 }
0x1071   : > { %1944 = shalt.err (!%p1941_p3)
}
0x1072   : > { %s1945_s12 = scalar_lea.hbm %s2321_s7, 128  ;;  %s1949_s15 = scalar_lea.hbm %s2369_s5, 256 }
0x1073   : > { %p1946_p4 = scmp.ne.s32.totalorder %s2321_s7, %s1945_s12  ;;  %p1950_p9 = scmp.lt.u32.totalorder %s2321_s7, %s2369_s5 }
0x1074   : > { %p1951_p10 = scmp.lt.u32.totalorder %s1949_s15, %s1945_s12  ;;  %p1953_p12 = scmp.lt.u32.totalorder %s1945_s12, %s2321_s7 }
0x1075   : > { %p1947_p7 = pnand %p1946_p4, %p2078_p5 }
0x1076   : > { %p1952_p11 = por %p1951_p10, %p1950_p9 }
0x1077   : > { %p1948_p8 = pneg %p1947_p7 }
0x1078   : > { %p1954_p13 = por %p1953_p12, %p1952_p11 }
0x107a   : > { %p1955_p0 = pnand %p1954_p13, %p1948_p8 }
0x107c   : > { %1958 = shalt.err (!%p1955_p0)
}
0x107d   : > { %1854 = dma.vmem_to_hbm [thread:$0]  (%p2078_p5), %s2323_s26, 128, %s2321_s7, %s1532_s8  }
0x107e PF: > { %p1860_p1 = scmp.ge.s32.totalorder %s1993_s21, 2  ;;  %s1557_s23 = sand.u32 1, %s1981_s18  }
0x107f   : > { %s1558_s25 = scalar_lea.sflag [#allocation3], %s1557_s23 }
0x1080   : > { %p1857_p2 = pnand %p1860_p1, %p2082_p6 }
0x1082   : > { %1976 = dma.done.wait (!%p1857_p2), %s1558_s25, 128  }
0x1083   : > { %1978 = vsyncadd (!%p1857_p2), %s1558_s25, 4294967168  ;;  %p15_p3 = scmp.ge.s32.totalorder %s2065_s24, 4   ;;  %s2372_s18 = smov %s1985_s19 }
0x1084   : > { %s2373_s19 = smov %s1989_s20  ;;  %s2374_s20 = smov %s2076_s27 }
0x1085   : > { %s2375_s21 = smov %s2065_s24  ;;  %17 = sbr.rel (!%p15_p3) target bundleno = 3 (0x3), region = 78 }
0x108c   :  { %1563 = vsyncpa [#allocation3], 1 }
0x108d   :  { %1565 = vsyncpa [#allocation3 + $0x1], 1 }

</bundles_post_ra>
